<compile_context>
chip_gen: v7x
topology: tpu7x:2x2x1
jax: 0.10.0
libtpu: 0.0.40
codegen_flags: <defaults>
</compile_context>

<pallas_src>
import functools

import jax
import jax.numpy as jnp
from jax import lax
from jax.experimental import pallas as pl
from jax.experimental.pallas import tpu as pltpu


def _round_up(x, m):
    return (x + m - 1) // m * m


def _hash_u32(x):
    """splitmix32-style avalanche hash on uint32 (VPU int ops only)."""
    x = x ^ (x >> 16)
    x = x * jnp.uint32(0x7FEB352D)
    x = x ^ (x >> 15)
    x = x * jnp.uint32(0x846CA68B)
    x = x ^ (x >> 16)
    return x


def _mlp_kernel(seed_ref, x_ref, w1_ref, b1_ref, w2_ref, b2_ref, o_ref,
                *, tm, p_drop, training, neg_slope):
    """Fused: (x @ W1 + b1) -> LeakyReLU -> Dropout -> (@ W2 + b2)."""
    # In-kernel cast to bf16 (VPU, hidden under the x DMA); f32 accumulation.
    x = x_ref[...].astype(jnp.bfloat16)
    h = jnp.dot(x, w1_ref[...], preferred_element_type=jnp.float32)
    h = h + b1_ref[...]
    # LeakyReLU (PyTorch default negative_slope = 0.01).
    h = jnp.where(h > 0.0, h, neg_slope * h)

    if training and p_drop > 0.0:
        # Inverted dropout with a counter-based hash PRNG.  Keyed on the
        # global (row, col) index so the mask is independent of the tiling.
        row0 = pl.program_id(0) * tm
        rows = lax.broadcasted_iota(jnp.int32, h.shape, 0) + row0
        cols = lax.broadcasted_iota(jnp.int32, h.shape, 1)
        idx = (rows * h.shape[1] + cols).astype(jnp.uint32)
        seed_u = seed_ref[0].astype(jnp.uint32) * jnp.uint32(0x9E3779B9)
        bits = _hash_u32(idx ^ seed_u)
        thresh = jnp.uint32(int(p_drop * 4294967296.0))
        keep = bits >= thresh                       # P(keep) = 1 - p_drop
        h = jnp.where(keep, h * (1.0 / (1.0 - p_drop)), 0.0)

    # Second GEMM; hidden activations fed back to the MXU as bf16.
    y = jnp.dot(h.astype(w2_ref.dtype), w2_ref[...],
                preferred_element_type=jnp.float32)
    o_ref[...] = y + b2_ref[...]


def prepare_mlp_params(params):
    """One-time weight prep (transpose, pad to 128 lanes, bf16 cast).

    Hoisted out of the forward pass so the per-call XLA copy ops disappear.
    Returns (array dict, (d, hidden_d, nr_classes)).
    """
    w1, b1 = params["hidden1_w"], params["hidden1_b"]   # (H, D), (H,)
    w2, b2 = params["out_w"], params["out_b"]           # (C, H), (C,)
    hidden_d, d = w1.shape
    nr_classes = w2.shape[0]

    d_p = _round_up(d, 128)
    h_p = _round_up(hidden_d, 128)
    c_p = _round_up(nr_classes, 128)

    w1_p = jnp.zeros((d_p, h_p), jnp.float32).at[:d, :hidden_d].set(w1.T)
    w2_p = jnp.zeros((h_p, c_p), jnp.float32).at[:hidden_d, :nr_classes].set(w2.T)
    prepared = {
        "w1": w1_p.astype(jnp.bfloat16),
        "b1": jnp.zeros((1, h_p), jnp.float32).at[0, :hidden_d].set(b1),
        "w2": w2_p.astype(jnp.bfloat16),
        "b2": jnp.zeros((1, c_p), jnp.float32).at[0, :nr_classes].set(b2),
    }
    return prepared, (d, hidden_d, nr_classes)


def mlp_forward(prepared, x, *, nr_classes, training=True, seed=0, tm_max=512):
    """PyTorch MLP.forward: x.float(); view(N,-1); Linear; LeakyReLU; Dropout; Linear."""
    n = x.shape[0]
    x2 = jnp.reshape(x, (n, -1)).astype(jnp.float32)
    d = x2.shape[1]

    d_p, h_p = prepared["w1"].shape
    c_p = prepared["w2"].shape[1]

    # Row tiling: align rows to 8 (f32 sublane), derive the tile from cdiv so a
    # non-aligned batch wastes at most ~8 rows per tile (not tm-1), and keep at
    # least 2 tiles when possible so v7x's second TensorCore gets work.
    m_aligned = _round_up(n, 8)
    num_tiles = max(1, pl.cdiv(m_aligned, tm_max))
    if m_aligned >= 16:
        num_tiles = max(num_tiles, 2)
    tm = _round_up(pl.cdiv(m_aligned, num_tiles), 8)
    m_p = tm * num_tiles

    # Pad x only when actually needed; no bf16 copy in HBM (cast is in-kernel).
    if (m_p, d_p) != (n, d):
        x_in = jnp.zeros((m_p, d_p), jnp.float32).at[:n, :d].set(x2)
    else:
        x_in = x2

    seed_arr = jnp.array([seed], jnp.int32)

    kernel = functools.partial(
        _mlp_kernel, tm=tm, p_drop=0.2, training=training, neg_slope=0.01)

    # Explicit VMEM budget: double-buffered x/out tiles + resident weights.
    vmem_bytes = (2 * tm * d_p * 4 + 2 * tm * c_p * 4
                  + 2 * (d_p * h_p + h_p * c_p) * 2
                  + 2 * (h_p + c_p) * 4)
    cp_kwargs = dict(dimension_semantics=("parallel",))
    if vmem_bytes > 16 * 1024 * 1024:       # v5e scoped default is 16 MiB
        cp_kwargs["vmem_limit_bytes"] = int(min(vmem_bytes * 5 // 4,
                                                100 * 1024 * 1024))

    out = pl.pallas_call(
        kernel,
        out_shape=jax.ShapeDtypeStruct((m_p, c_p), jnp.float32),
        grid_spec=pltpu.PrefetchScalarGridSpec(
            num_scalar_prefetch=1,            # dropout seed in SMEM
            grid=(num_tiles,),                # tiled over batch rows
            in_specs=[
                pl.BlockSpec((tm, d_p), lambda i, s: (i, 0)),    # x rows (pipelined)
                pl.BlockSpec((d_p, h_p), lambda i, s: (0, 0)),   # W1 (resident)
                pl.BlockSpec((1, h_p), lambda i, s: (0, 0)),     # b1
                pl.BlockSpec((h_p, c_p), lambda i, s: (0, 0)),   # W2 (resident)
                pl.BlockSpec((1, c_p), lambda i, s: (0, 0)),     # b2
            ],
            out_specs=pl.BlockSpec((tm, c_p), lambda i, s: (i, 0)),
        ),
        compiler_params=pltpu.CompilerParams(**cp_kwargs),
    )(seed_arr, x_in, prepared["w1"], prepared["b1"],
      prepared["w2"], prepared["b2"])
    return out[:n, :nr_classes]


def mlp_reference(params, x):
    """Pure-JAX reference (eval mode: dropout = identity)."""
    n = x.shape[0]
    x2 = jnp.reshape(x, (n, -1)).astype(jnp.float32)
    h = x2 @ params["hidden1_w"].T + params["hidden1_b"]
    h = jnp.where(h > 0.0, h, 0.01 * h)
    return h @ params["out_w"].T + params["out_b"]


if __name__ == "__main__":
    key = jax.random.PRNGKey(0)
    batch, c, hgt, wdt = 2, 4, 16, 16
    d = c * hgt * wdt            # 1024
    hidden_d, nr_classes = 32, 5

    k1, k2, k3, k4, kx = (jax.random.fold_in(key, i) for i in range(5))
    params = {
        "hidden1_w": 0.05 * jax.random.normal(k1, (hidden_d, d), jnp.float32),
        "hidden1_b": 0.01 * jax.random.normal(k2, (hidden_d,), jnp.float32),
        "out_w": 0.05 * jax.random.normal(k3, (nr_classes, hidden_d), jnp.float32),
        "out_b": 0.01 * jax.random.normal(k4, (nr_classes,), jnp.float32),
    }
    x = jax.random.normal(kx, (batch, c, hgt, wdt), jnp.float32)

    # One-time parameter prep (hoisted out of the forward pass).
    prepared, (_, _, ncls) = prepare_mlp_params(params)

    # Eval-mode path (dropout off): check against a pure-JAX f32 reference.
    fwd_eval = jax.jit(functools.partial(
        mlp_forward, nr_classes=ncls, training=False))
    out_eval = fwd_eval(prepared, x)
    jax.block_until_ready(out_eval)
    ref = mlp_reference(params, x)
    assert out_eval.shape == (batch, nr_classes)
    assert jnp.max(jnp.abs(out_eval - ref)) < 5e-2, "eval-mode mismatch vs reference"

    # Train-mode path (module default: dropout active via in-kernel hash PRNG).
    fwd_train = jax.jit(functools.partial(
        mlp_forward, nr_classes=ncls, training=True, seed=123))
    out_train = fwd_train(prepared, x)
    jax.block_until_ready(out_train)
    assert out_train.shape == (batch, nr_classes)
    assert bool(jnp.all(jnp.isfinite(out_train)))

    print("KERNEL_OK")
</pallas_src>

<mosaic_0001>
module attributes {stable_mosaic.version = 11 : i64} {
  func.func @_mlp_kernel(%arg0: i32, %arg1: memref<1xi32, #tpu.memory_space<smem>>, %arg2: memref<8x1024xf32, #tpu.memory_space<vmem>>, %arg3: memref<1024x128xbf16, #tpu.memory_space<vmem>>, %arg4: memref<1x128xf32, #tpu.memory_space<vmem>>, %arg5: memref<128x128xbf16, #tpu.memory_space<vmem>>, %arg6: memref<1x128xf32, #tpu.memory_space<vmem>>, %arg7: memref<8x128xf32, #tpu.memory_space<vmem>>) attributes {dimension_semantics = [#tpu.dimension_semantics<parallel>], iteration_bounds = array<i64: 1>, scalar_prefetch = 1 : i64, scratch_operands = 0 : i64, tpu.core_type = #tpu.core_type<tc>, window_params = [{transform_indices = @transform_0, window_bounds = array<i64: 8, 1024>}, {pipeline_mode = #tpu.pipeline_mode<synchronous>, transform_indices = @transform_1, window_bounds = array<i64: 1024, 128>}, {pipeline_mode = #tpu.pipeline_mode<synchronous>, transform_indices = @transform_2, window_bounds = array<i64: 1, 128>}, {pipeline_mode = #tpu.pipeline_mode<synchronous>, transform_indices = @transform_3, window_bounds = array<i64: 128, 128>}, {pipeline_mode = #tpu.pipeline_mode<synchronous>, transform_indices = @transform_4, window_bounds = array<i64: 1, 128>}, {transform_indices = @transform_5, window_bounds = array<i64: 8, 128>}]} {
    %c0 = arith.constant 0 : index
    %c0_0 = arith.constant 0 : index
    %0 = vector.load %arg2[%c0, %c0_0] : memref<8x1024xf32, #tpu.memory_space<vmem>>, vector<8x1024xf32>
    %1 = arith.truncf %0 : vector<8x1024xf32> to vector<8x1024xbf16>
    %c0_1 = arith.constant 0 : index
    %c0_2 = arith.constant 0 : index
    %2 = vector.load %arg3[%c0_1, %c0_2] : memref<1024x128xbf16, #tpu.memory_space<vmem>>, vector<1024x128xbf16>
    %cst = arith.constant dense<0.000000e+00> : vector<8x128xf32>
    %3 = tpu.matmul %1, %2, %cst {dimension_numbers = #tpu.dot_dimension_numbers<[1], [0], [0], [1], [0, 0, 1, 1], [], []>} : vector<8x1024xbf16>, vector<1024x128xbf16>, vector<8x128xf32> -> vector<8x128xf32>
    %c0_3 = arith.constant 0 : index
    %c0_4 = arith.constant 0 : index
    %4 = vector.load %arg4[%c0_3, %c0_4] : memref<1x128xf32, #tpu.memory_space<vmem>>, vector<1x128xf32>
    %5 = vector.broadcast %4 : vector<1x128xf32> to vector<8x128xf32>
    %6 = arith.addf %3, %5 : vector<8x128xf32>
    %cst_5 = arith.constant 0.000000e+00 : f32
    %7 = vector.broadcast %cst_5 : f32 to vector<8x128xf32>
    %8 = arith.cmpf ogt, %6, %7 : vector<8x128xf32>
    %cst_6 = arith.constant 0.00999999977 : f32
    %9 = vector.broadcast %cst_6 : f32 to vector<8x128xf32>
    %10 = arith.mulf %9, %6 : vector<8x128xf32>
    %11 = arith.select %8, %6, %10 : vector<8x128xi1>, vector<8x128xf32>
    %12 = arith.truncf %11 : vector<8x128xf32> to vector<8x128xbf16>
    %c0_7 = arith.constant 0 : index
    %c0_8 = arith.constant 0 : index
    %13 = vector.load %arg5[%c0_7, %c0_8] : memref<128x128xbf16, #tpu.memory_space<vmem>>, vector<128x128xbf16>
    %cst_9 = arith.constant dense<0.000000e+00> : vector<8x128xf32>
    %14 = tpu.matmul %12, %13, %cst_9 {dimension_numbers = #tpu.dot_dimension_numbers<[1], [0], [0], [1], [0, 0, 1, 1], [], []>} : vector<8x128xbf16>, vector<128x128xbf16>, vector<8x128xf32> -> vector<8x128xf32>
    %c0_10 = arith.constant 0 : index
    %c0_11 = arith.constant 0 : index
    %15 = vector.load %arg6[%c0_10, %c0_11] : memref<1x128xf32, #tpu.memory_space<vmem>>, vector<1x128xf32>
    %16 = vector.broadcast %15 : vector<1x128xf32> to vector<8x128xf32>
    %17 = arith.addf %14, %16 : vector<8x128xf32>
    %c0_12 = arith.constant 0 : index
    %c0_13 = arith.constant 0 : index
    %18 = vector.load %arg7[%c0_12, %c0_13] : memref<8x128xf32, #tpu.memory_space<vmem>>, vector<8x128xf32>
    tpu.vector_store %arg7[%c0_12, %c0_13], %17 {strides = array<i32>} : memref<8x128xf32, #tpu.memory_space<vmem>>, vector<8x128xf32>,
    return
  }
  func.func @transform_0(%arg0: i32, %arg1: memref<1xi32, #tpu.memory_space<smem>>) -> (i32, i32) {
    %c0_i32 = arith.constant 0 : i32
    %c0_i32_0 = arith.constant 0 : i32
    return %arg0, %c0_i32 : i32, i32
  }
  func.func @transform_1(%arg0: i32, %arg1: memref<1xi32, #tpu.memory_space<smem>>) -> (i32, i32) {
    %c0_i32 = arith.constant 0 : i32
    %c0_i32_0 = arith.constant 0 : i32
    %c0_i32_1 = arith.constant 0 : i32
    return %c0_i32, %c0_i32_0 : i32, i32
  }
  func.func @transform_2(%arg0: i32, %arg1: memref<1xi32, #tpu.memory_space<smem>>) -> (i32, i32) {
    %c0_i32 = arith.constant 0 : i32
    %c0_i32_0 = arith.constant 0 : i32
    %c0_i32_1 = arith.constant 0 : i32
    return %c0_i32, %c0_i32_0 : i32, i32
  }
  func.func @transform_3(%arg0: i32, %arg1: memref<1xi32, #tpu.memory_space<smem>>) -> (i32, i32) {
    %c0_i32 = arith.constant 0 : i32
    %c0_i32_0 = arith.constant 0 : i32
    %c0_i32_1 = arith.constant 0 : i32
    return %c0_i32, %c0_i32_0 : i32, i32
  }
  func.func @transform_4(%arg0: i32, %arg1: memref<1xi32, #tpu.memory_space<smem>>) -> (i32, i32) {
    %c0_i32 = arith.constant 0 : i32
    %c0_i32_0 = arith.constant 0 : i32
    %c0_i32_1 = arith.constant 0 : i32
    return %c0_i32, %c0_i32_0 : i32, i32
  }
  func.func @transform_5(%arg0: i32, %arg1: memref<1xi32, #tpu.memory_space<smem>>) -> (i32, i32) {
    %c0_i32 = arith.constant 0 : i32
    %c0_i32_0 = arith.constant 0 : i32
    return %arg0, %c0_i32 : i32, i32
  }
}

</mosaic_0001>

<bundles_post_ra>
// kernel: mlp_forward.1
= control target key start
LH: loop header
LB: loop body
LE: loop exit
PB: predicated region body
PF: predicated region fallthrough
CT: control target
= control target key end

     0   :  { %12 = vsyncpa [#allocation5], 0  ;;  %s1145_s0 = smov [#allocation4]   ;;  %s1254_s0 = inlined_call_operand.<no memory space> [shape: s32[1], index: 0, kind: input, shape index: {}]   ;;  %s1255_s1 = inlined_call_operand.vmem [shape: f32[8,1024], index: 1, kind: input, shape index: {}]   ;;  %s1256_s2 = inlined_call_operand.hbm [shape: bf16[1024,128], index: 2, kind: input, shape index: {}]   ;;  %s1257_s3 = inlined_call_operand.vmem [shape: f32[1,128], index: 3, kind: input, shape index: {}]   ;;  %s1258_s4 = inlined_call_operand.vmem [shape: bf16[128,128], index: 4, kind: input, shape index: {}]   ;;  %s1259_s5 = inlined_call_operand.vmem [shape: f32[1,128], index: 5, kind: input, shape index: {}]   ;;  %s1260_s6 = inlined_call_operand.vmem [shape: f32[8,128], index: 6, kind: output, shape index: {}]  }
   0x1   :  { %s20_s21 = sshll.u32 %s1145_s0, 4  ;;  %s1121_s24 = scalar_lea.hbm %s1256_s2, 8192  ;;  %s21_s21 = int_to_ptr.vmem [resolvable:$true] %s20_s21 }
   0x2   :  { %p1122_p0 = scmp.ne.s32.totalorder %s1256_s2, %s1121_s24  ;;  %p1125_p1 = scmp.lt.u32.totalorder %s1121_s24, %s1256_s2 }
   0x4   :  { %p1127_p2 = pnand %p1125_p1, %p1122_p0 }
   0x6   :  { %1130 = shalt.err (!%p1127_p2)
}
   0x7   :  { %s1131_s29 = scalar_lea.vmem %s21_s21, 8192  ;;  %p1136_p4 = scmp.lt.s32.totalorder %s21_s21, %s21_s21 }
   0x8   :  { %p1132_p3 = scmp.ne.s32.totalorder %s21_s21, %s1131_s29  ;;  %p1137_p5 = scmp.lt.s32.totalorder %s1131_s29, %s1131_s29 }
   0xa   :  { %p1138_p6 = por %p1137_p5, %p1136_p4 }
   0xc   :  { %p1139_p7 = pnand %p1138_p6, %p1132_p3 }
   0xe   :  { %1142 = shalt.err (!%p1139_p7)
}
   0xf   :  { %s1146_s30 = smov 64   ;;  %s1147_s7 = smov 4  }
  0x10   :  { %26 = dma.hbm_to_vmem [thread:$0]  %s1256_s2, 8192, %s21_s21, [#allocation5], %s1146_s30, %s1146_s30, %s1147_s7  }
  0x11   :  { %1143 = dma.done.wait [#allocation5], 8192  }
  0x12   :  { %1144 = vsyncadd [#allocation5], 4294959104  ;;  %v1049_v0 = vld [vmem:[#allocation4 + $0x40] sm:$0xff]   ;;  %v1053_v4 = vld [vmem:[#allocation4 + $0x48] sm:$0xff]   ;;  %vm1149_vm0 = vmmov 0  }
  0x13   :  { %v1050_v1 = vld [vmem:[#allocation4 + $0xc0] sm:$0xff]   ;;  %927 = vmatprep.subr.bf16.mxu0 %v1049_v0  ;;  %v1054_v5 = vld [vmem:[#allocation4 + $0xc8] sm:$0xff]   ;;  %v1057_v8 = vld [vmem:[#allocation4 + $0x50] sm:$0xff]  }
  0x14   :  { %v1051_v2 = vld [vmem:[#allocation4] sm:$0xff]   ;;  %949 = vmatprep.subr.bf16.mxu1 %v1050_v1  ;;  %v1055_v6 = vld [vmem:[#allocation4 + $0x8] sm:$0xff]   ;;  %v1058_v9 = vld [vmem:[#allocation4 + $0xd0] sm:$0xff]  }
  0x15   :  { %v1052_v3 = vld [vmem:[#allocation4 + $0x80] sm:$0xff]   ;;  %928 = vmatpush3.bf16.msra.mxu0 %v1051_v2  ;;  %v1056_v7 = vld [vmem:[#allocation4 + $0x88] sm:$0xff]   ;;  %v1059_v10 = vld [vmem:[#allocation4 + $0x10] sm:$0xff]  }
  0x16   :  { %950 = vmatpush3.bf16.msra.mxu1 %v1052_v3  ;;  %929 = vmatprep.subr.bf16.mxu0 %v1053_v4  ;;  %v1060_v11 = vld [vmem:[#allocation4 + $0x90] sm:$0xff]   ;;  %v1061_v12 = vld [vmem:[#allocation4 + $0x58] sm:$0xff]   ;;  %v1065_v16 = vld [vmem:[#allocation4 + $0x60] sm:$0xff]  }
  0x17   :  { %951 = vmatprep.subr.bf16.mxu1 %v1054_v5  ;;  %v1062_v13 = vld [vmem:[#allocation4 + $0xd8] sm:$0xff]   ;;  %v1066_v17 = vld [vmem:[#allocation4 + $0xe0] sm:$0xff]   ;;  %v1069_v20 = vld [vmem:[#allocation4 + $0x68] sm:$0xff]  }
  0x18   :  { %v1063_v14 = vld [vmem:[#allocation4 + $0x18] sm:$0xff]   ;;  %v1067_v18 = vld [vmem:[#allocation4 + $0x20] sm:$0xff]   ;;  %v1070_v21 = vld [vmem:[#allocation4 + $0xe8] sm:$0xff]  }
  0x19   :  { %930 = vmatpush3.bf16.msra.mxu0 %v1055_v6  ;;  %v1064_v15 = vld [vmem:[#allocation4 + $0x98] sm:$0xff]   ;;  %v1068_v19 = vld [vmem:[#allocation4 + $0xa0] sm:$0xff]   ;;  %v1071_v22 = vld [vmem:[#allocation4 + $0x28] sm:$0xff]  }
  0x1a   :  { %952 = vmatpush3.bf16.msra.mxu1 %v1056_v7  ;;  %931 = vmatprep.subr.bf16.mxu0 %v1057_v8  ;;  %v1072_v23 = vld [vmem:[#allocation4 + $0xa8] sm:$0xff]   ;;  %v1073_v24 = vld [vmem:[#allocation4 + $0x70] sm:$0xff]   ;;  %v1077_v28 = vld [vmem:[#allocation4 + $0x78] sm:$0xff]  }
  0x1b   :  { %953 = vmatprep.subr.bf16.mxu1 %v1058_v9  ;;  %v1074_v25 = vld [vmem:[#allocation4 + $0xf0] sm:$0xff]   ;;  %v1078_v29 = vld [vmem:[#allocation4 + $0xf8] sm:$0xff]   ;;  %v38_v32 = vld [vmem:[%s1255_s1 + $0x8] sm:$0xff] }
  0x1c   :  { %v1075_v26 = vld [vmem:[#allocation4 + $0x30] sm:$0xff]   ;;  %v1079_v30 = vld [vmem:[#allocation4 + $0x38] sm:$0xff]   ;;  %v37_v34 = vld [vmem:[%s1255_s1] sm:$0xff]  ;;  %v46_v35 = vpack.c.bf16 %v38_v32, %v38_v32 }
  0x1d   :  { %932 = vmatpush3.bf16.msra.mxu0 %v1059_v10  ;;  %v1076_v27 = vld [vmem:[#allocation4 + $0xb0] sm:$0xff]   ;;  %v1080_v31 = vld [vmem:[#allocation4 + $0xb8] sm:$0xff]   ;;  %v45_v37 = vpack.c.bf16 %v37_v34, %v37_v34  ;;  %v1081_v40 = vld [vmem:[#allocation4 + $0x140] sm:$0xff]  }
  0x1e   :  { %954 = vmatpush3.bf16.msra.mxu1 %v1060_v11  ;;  %933 = vmatprep.subr.bf16.mxu0 %v1061_v12  ;;  %v40_v33 = vld [vmem:[%s1255_s1 + $0x18] sm:$0xff]  ;;  %v39_v38 = vld [vmem:[%s1255_s1 + $0x10] sm:$0xff]  ;;  %v1082_v41 = vld [vmem:[#allocation4 + $0x1c0] sm:$0xff]  }
  0x1f   :  { %955 = vmatprep.subr.bf16.mxu1 %v1062_v13  ;;  %v48_v36 = vpack.c.bf16 %v40_v33, %v40_v33  ;;  %v47_v39 = vpack.c.bf16 %v39_v38, %v39_v38  ;;  %604 = vmatprep.mubr.bf16.mxu0 %v46_v35  ;;  %v1083_v42 = vld [vmem:[#allocation4 + $0x100] sm:$0xff]   ;;  %v1085_v44 = vld [vmem:[#allocation4 + $0x148] sm:$0xff]   ;;  %v1089_v48 = vld [vmem:[#allocation4 + $0x150] sm:$0xff]  }
  0x20   :  { %v1084_v43 = vld [vmem:[#allocation4 + $0x180] sm:$0xff]   ;;  %v1086_v45 = vld [vmem:[#allocation4 + $0x1c8] sm:$0xff]   ;;  %v1090_v49 = vld [vmem:[#allocation4 + $0x1d0] sm:$0xff]  }
  0x21   :  { %934 = vmatpush3.bf16.msra.mxu0 %v1063_v14  ;;  %644 = vmatprep.mubr.bf16.mxu1 %v48_v36  ;;  %v1087_v46 = vld [vmem:[#allocation4 + $0x108] sm:$0xff]   ;;  %v1091_v50 = vld [vmem:[#allocation4 + $0x110] sm:$0xff]   ;;  %v1093_v52 = vld [vmem:[#allocation4 + $0x158] sm:$0xff]  }
  0x22   :  { %956 = vmatpush3.bf16.msra.mxu1 %v1064_v15  ;;  %935 = vmatprep.subr.bf16.mxu0 %v1065_v16  ;;  %v1088_v47 = vld [vmem:[#allocation4 + $0x188] sm:$0xff]   ;;  %v1092_v51 = vld [vmem:[#allocation4 + $0x190] sm:$0xff]   ;;  %v1094_v53 = vld [vmem:[#allocation4 + $0x1d8] sm:$0xff]  }
  0x23   :  { %957 = vmatprep.subr.bf16.mxu1 %v1066_v17  ;;  %v1095_v54 = vld [vmem:[#allocation4 + $0x118] sm:$0xff]   ;;  %v1097_v56 = vld [vmem:[#allocation4 + $0x160] sm:$0xff]   ;;  %v1101_v60 = vld [vmem:[#allocation4 + $0x168] sm:$0xff]   ;;  %v1148_v17 = vmov 0.0  }
  0x24   :  { %v1096_v55 = vld [vmem:[#allocation4 + $0x198] sm:$0xff]   ;;  %v1098_v57 = vld [vmem:[#allocation4 + $0x1e0] sm:$0xff]   ;;  %v1102_v61 = vld [vmem:[#allocation4 + $0x1e8] sm:$0xff]  }
  0x25   :  { %936 = vmatpush3.bf16.msra.mxu0 %v1067_v18  ;;  %v1099_v58 = vld [vmem:[#allocation4 + $0x120] sm:$0xff]   ;;  %v1103_v62 = vld [vmem:[#allocation4 + $0x128] sm:$0xff]   ;;  %v1105_v0 = vld [vmem:[#allocation4 + $0x170] sm:$0xff]  }
  0x26   :  { %958 = vmatpush3.bf16.msra.mxu1 %v1068_v19  ;;  %937 = vmatprep.subr.bf16.mxu0 %v1069_v20  ;;  %v1100_v59 = vld [vmem:[#allocation4 + $0x1a0] sm:$0xff]   ;;  %v1104_v63 = vld [vmem:[#allocation4 + $0x1a8] sm:$0xff]   ;;  %v1106_v1 = vld [vmem:[#allocation4 + $0x1f0] sm:$0xff]  }
  0x27   :  { %959 = vmatprep.subr.bf16.mxu1 %v1070_v21  ;;  %v1107_v2 = vld [vmem:[#allocation4 + $0x130] sm:$0xff]   ;;  %v1109_v4 = vld [vmem:[#allocation4 + $0x178] sm:$0xff]   ;;  %v42_v8 = vld [vmem:[%s1255_s1 + $0x28] sm:$0xff] }
  0x28   :  { %v1108_v3 = vld [vmem:[#allocation4 + $0x1b0] sm:$0xff]   ;;  %v1110_v5 = vld [vmem:[#allocation4 + $0x1f8] sm:$0xff]   ;;  %v50_v10 = vpack.c.bf16 %v42_v8, %v42_v8  ;;  %v41_v12 = vld [vmem:[%s1255_s1 + $0x20] sm:$0xff] }
  0x29   :  { %938 = vmatpush3.bf16.msra.mxu0 %v1071_v22  ;;  %v1111_v6 = vld [vmem:[#allocation4 + $0x138] sm:$0xff]   ;;  %v43_v13 = vld [vmem:[%s1255_s1 + $0x30] sm:$0xff]  ;;  %v49_v14 = vpack.c.bf16 %v41_v12, %v41_v12  ;;  %v1113_v16 = vld [vmem:[%s1258_s4] sm:$0xff]  }
  0x2a   :  { %960 = vmatpush3.bf16.msra.mxu1 %v1072_v23  ;;  %939 = vmatprep.subr.bf16.mxu0 %v1073_v24  ;;  %v1112_v7 = vld [vmem:[#allocation4 + $0x1b8] sm:$0xff]   ;;  %v51_v15 = vpack.c.bf16 %v43_v13, %v43_v13  ;;  %v1114_v18 = vld [vmem:[%s1258_s4 + $0x8] sm:$0xff]   ;;  %v1115_v19 = vld [vmem:[%s1258_s4 + $0x10] sm:$0xff]  }
  0x2b   :  { %961 = vmatprep.subr.bf16.mxu1 %v1074_v25  ;;  %v44_v9 = vld [vmem:[%s1255_s1 + $0x38] sm:$0xff]  ;;  %v1117_v21 = vld [vmem:[%s1258_s4 + $0x20] sm:$0xff]   ;;  %v1118_v22 = vld [vmem:[%s1258_s4 + $0x28] sm:$0xff]  }
  0x2c   :  { %v52_v11 = vpack.c.bf16 %v44_v9, %v44_v9  ;;  %v1116_v20 = vld [vmem:[%s1258_s4 + $0x18] sm:$0xff]   ;;  %v1119_v23 = vld [vmem:[%s1258_s4 + $0x30] sm:$0xff]  }
  0x2d   :  { %940 = vmatpush3.bf16.msra.mxu0 %v1075_v26  ;;  %v1120_v24 = vld [vmem:[%s1258_s4 + $0x38] sm:$0xff]  }
  0x2e   :  { %962 = vmatpush3.bf16.msra.mxu1 %v1076_v27  ;;  %941 = vmatprep.subr.bf16.mxu0 %v1077_v28  ;;  %v853_v27 = vld [vmem:[%s1257_s3] ss:$0 sm:$0xff] }
  0x2f   :  { %963 = vmatprep.subr.bf16.mxu1 %v1078_v29 }
  0x31   :  { %942 = vmatpush3.bf16.msra.mxu0 %v1079_v30 }
  0x32   :  { %964 = vmatpush3.bf16.msra.mxu1 %v1080_v31  ;;  %971 = vmatprep.subr.bf16.mxu0 %v1081_v40 }
  0x33   :  { %993 = vmatprep.subr.bf16.mxu1 %v1082_v41 }
  0x34   :  { %605 = vmatmul.mubr.bf16.vlgmr.msra.gmra.mrb[0].mxu0 %v45_v37 }
  0x35   :  { %645 = vmatmul.mubr.bf16.vlgmr.msra.gmra.mrb[0].mxu1 %v47_v39  ;;  %972 = vmatpush3.bf16.msra.mxu0 %v1083_v42 }
  0x36   :  { %994 = vmatpush3.bf16.msra.mxu1 %v1084_v43  ;;  %973 = vmatprep.subr.bf16.mxu0 %v1085_v44 }
  0x37   :  { %995 = vmatprep.subr.bf16.mxu1 %v1086_v45  ;;  %684 = vmatprep.mubr.bf16.mxu0 %v50_v10 }
  0x38   :  { %724 = vmatprep.mubr.bf16.mxu1 %v52_v11 }
  0x39   :  { %974 = vmatpush3.bf16.msra.mxu0 %v1087_v46 }
  0x3a   :  { %996 = vmatpush3.bf16.msra.mxu1 %v1088_v47  ;;  %975 = vmatprep.subr.bf16.mxu0 %v1089_v48 }
  0x3b   :  { %997 = vmatprep.subr.bf16.mxu1 %v1090_v49 }
  0x3d   :  { %976 = vmatpush3.bf16.msra.mxu0 %v1091_v50 }
  0x3e   :  { %998 = vmatpush3.bf16.msra.mxu1 %v1092_v51  ;;  %977 = vmatprep.subr.bf16.mxu0 %v1093_v52 }
  0x3f   :  { %999 = vmatprep.subr.bf16.mxu1 %v1094_v53  ;;  %v918_v53 = vld [vmem:[%s1259_s5] ss:$0 sm:$0xff] }
  0x41   :  { %978 = vmatpush3.bf16.msra.mxu0 %v1095_v54 }
  0x42   :  { %1000 = vmatpush3.bf16.msra.mxu1 %v1096_v55  ;;  %979 = vmatprep.subr.bf16.mxu0 %v1097_v56 }
  0x43   :  { %1001 = vmatprep.subr.bf16.mxu1 %v1098_v57 }
  0x45   :  { %980 = vmatpush3.bf16.msra.mxu0 %v1099_v58 }
  0x46   :  { %1002 = vmatpush3.bf16.msra.mxu1 %v1100_v59  ;;  %981 = vmatprep.subr.bf16.mxu0 %v1101_v60 }
  0x47   :  { %1003 = vmatprep.subr.bf16.mxu1 %v1102_v61 }
  0x49   :  { %982 = vmatpush3.bf16.msra.mxu0 %v1103_v62 }
  0x4a   :  { %1004 = vmatpush3.bf16.msra.mxu1 %v1104_v63  ;;  %983 = vmatprep.subr.bf16.mxu0 %v1105_v0 }
  0x4b   :  { %1005 = vmatprep.subr.bf16.mxu1 %v1106_v1 }
  0x4d   :  { %984 = vmatpush3.bf16.msra.mxu0 %v1107_v2 }
  0x4e   :  { %1006 = vmatpush3.bf16.msra.mxu1 %v1108_v3  ;;  %985 = vmatprep.subr.bf16.mxu0 %v1109_v4 }
  0x4f   :  { %1007 = vmatprep.subr.bf16.mxu1 %v1110_v5 }
  0x51   :  { %986 = vmatpush3.bf16.msra.mxu0 %v1111_v6 }
  0x52   :  { %1008 = vmatpush3.bf16.msra.mxu1 %v1112_v7  ;;  %1024 = vmatprep.subr.bf16.mxu0 %v1148_v17 }
  0x54   :  { %685 = vmatmul.mubr.bf16.vlgmr.msra.gmra.mrb[4].mxu0 %v49_v14 }
  0x55   :  { %725 = vmatmul.mubr.bf16.vlgmr.msra.gmra.mrb[4].mxu1 %v51_v15  ;;  %1025 = vmatpush3.bf16.msra.mxu0 %v1113_v16 }
  0x56   :  { %1026 = vmatprep.subr.bf16.mxu0 %v1148_v17  ;;  %1040 = vmatprep.mubr.msk.bf16.mxu0 %vm1149_vm0, %v1148_v17 }
  0x59   :  { %1027 = vmatpush3.bf16.msra.mxu0 %v1114_v18 }
  0x5a   :  { %1028 = vmatprep.subr.bf16.mxu0 %v1148_v17 }
  0x5d   :  { %1029 = vmatpush3.bf16.msra.mxu0 %v1115_v19 }
  0x5e   :  { %1030 = vmatprep.subr.bf16.mxu0 %v1148_v17 }
  0x61   :  { %1031 = vmatpush3.bf16.msra.mxu0 %v1116_v20 }
  0x62   :  { %1032 = vmatprep.subr.bf16.mxu0 %v1148_v17 }
  0x65   :  { %1033 = vmatpush3.bf16.msra.mxu0 %v1117_v21 }
  0x66   :  { %1034 = vmatprep.subr.bf16.mxu0 %v1148_v17 }
  0x69   :  { %1035 = vmatpush3.bf16.msra.mxu0 %v1118_v22 }
  0x6a   :  { %1036 = vmatprep.subr.bf16.mxu0 %v1148_v17 }
  0x6d   :  { %1037 = vmatpush3.bf16.msra.mxu0 %v1119_v23 }
  0x6e   :  { %1038 = vmatprep.subr.bf16.mxu0 %v1148_v17 }
  0x71   :  { %1039 = vmatpush3.bf16.msra.mxu0 %v1120_v24 }
 0x107   :  { %v943_v25 = vpop.f32.mrb[0].mxu0 }
 0x108   :  { %v965_v26 = vpop.f32.mrb[0].mxu1  ;;  %v944_v28 = vpop.f32.mrb[1].mxu0 }
 0x109   :  { %v966_v29 = vpop.f32.mrb[1].mxu1  ;;  %v945_v30 = vadd.f32 %v944_v28, %v943_v25  ;;  %v946_v32 = vpop.f32.mrb[2].mxu0 }
 0x10a   :  { %v967_v31 = vadd.f32 %v966_v29, %v965_v26  ;;  %v968_v33 = vpop.f32.mrb[2].mxu1  ;;  %v947_v34 = vpop.f32.mrb[3].mxu0 }
 0x10b   :  { %v969_v35 = vpop.f32.mrb[3].mxu1  ;;  %v607_v36 = vadd.f32 %v945_v30, %v853_v27 }
 0x10d   :  { %v647_v37 = vadd.f32 %v967_v31, %v607_v36 }
 0x127   :  { %v987_v38 = vpop.f32.mrb[4].mxu0 }
 0x128   :  { %v1009_v39 = vpop.f32.mrb[4].mxu1  ;;  %v988_v40 = vpop.f32.mrb[5].mxu0 }
 0x129   :  { %v989_v41 = vadd.f32 %v988_v40, %v987_v38  ;;  %v1010_v42 = vpop.f32.mrb[5].mxu1  ;;  %v990_v43 = vpop.f32.mrb[6].mxu0 }
 0x12a   :  { %v1011_v44 = vadd.f32 %v1010_v42, %v1009_v39  ;;  %v1012_v45 = vpop.f32.mrb[6].mxu1  ;;  %v991_v46 = vpop.f32.mrb[7].mxu0 }
 0x12b   :  { %v687_v47 = vadd.f32 %v989_v41, %v647_v37  ;;  %v1013_v48 = vpop.f32.mrb[7].mxu1 }
 0x12d   :  { %v727_v49 = vadd.f32 %v1011_v44, %v687_v47 }
 0x12f   :  { %vm732_vm1 = vcmp.gt.f32.partialorder %v727_v49, 0.0  ;;  %v733_v50 = vmul.f32 0.01, %v727_v49 }
 0x131   :  { %v734_v51 = vsel %vm732_vm1, %v727_v49, %v733_v50 }
 0x132   :  { %v735_v52 = vpack.c.bf16 %v734_v51, %v734_v51 }
 0x134   :  { %1041 = vmatmul.mubr.bf16.vlgmr.msra.gmra.mrb[8].mxu0 %v735_v52 }
 0x207   :  { %v841_v54 = vpop.f32.mrb[8].mxu0 }
 0x208   :  { %v842_v55 = vadd.f32 %v918_v53, %v841_v54  ;;  %v1042_v56 = vpop.f32.mrb[9].mxu0 }
 0x209   :  { %v844_v57 = vpop.f32.mrb[10].mxu0 }
 0x20a   :  { %847 = vst [vmem:[%s1260_s6] sm:$0xff] %v842_v55  ;;  %v1043_v58 = vpop.f32.mrb[11].mxu0 }
 0x20b   :  { %852 = vsyncpa [#allocation5], 1 }

</bundles_post_ra>
